<compile_context>
chip_gen: v7x
topology: tpu7x:2x2x1
jax: 0.10.0
libtpu: 0.0.40
codegen_flags: <defaults>
</compile_context>

<pallas_src>
import functools

import jax
import jax.numpy as jnp
from jax.experimental import pallas as pl
from jax.experimental.pallas import tpu as pltpu

_BN_EPS = 1e-5
_MAX_TILE_N = 1024  # rows per grid step; fits the scoped VMEM budget on v5e/v6e/v7x


def _round_up(x, m):
    return (x + m - 1) // m * m


def _mlp(x_ref, w1_ref, b1_ref, w2_ref):
    """Linear -> ReLU -> Linear (second bias omitted: it cancels under BatchNorm)."""
    h = jnp.dot(x_ref[...], w1_ref[...], preferred_element_type=jnp.float32)
    h = jnp.maximum(h + b1_ref[...], 0.0)
    return jnp.dot(h, w2_ref[...], preferred_element_type=jnp.float32)


def _stats_kernel(x_ref, w1_ref, b1_ref, w2_ref, stats_ref, *, n_valid, need_mask):
    """Pass 1: MLP per node tile + per-tile (sum, sum-of-squares) over the node axis."""
    h = _mlp(x_ref, w1_ref, b1_ref, w2_ref)                         # (tile_n, Dpad) f32
    if need_mask:  # last tile may contain zero-padded rows; exclude them from the moments
        row = (jax.lax.broadcasted_iota(jnp.int32, (h.shape[0], 1), 0)
               + pl.program_id(0) * h.shape[0])
        h = jnp.where(row < n_valid, h, 0.0)
    s = jnp.sum(h, axis=0, keepdims=True)                           # (1, Dpad)
    sq = jnp.sum(h * h, axis=0, keepdims=True)                      # (1, Dpad)
    stats_ref[...] = jnp.concatenate([s, sq], axis=0)[None]         # (1, 2, Dpad)


def _apply_kernel(x_ref, w1_ref, b1_ref, w2_ref, scale_ref, shift_ref, o_ref):
    """Pass 2: recompute MLP, apply fused BN affine (scale/shift) + ReLU."""
    h = _mlp(x_ref, w1_ref, b1_ref, w2_ref)
    o_ref[...] = jnp.maximum(h * scale_ref[...] + shift_ref[...], 0.0).astype(o_ref.dtype)


def node_transform(x, w1, b1, w2, b2, gamma, beta, *, max_tile_n=_MAX_TILE_N):
    """Fused NodeTransform forward: MLP -> BatchNorm1d (batch stats) -> ReLU."""
    del b2  # mathematically a no-op: training-mode BN subtracts the batch mean
    n, d_in = x.shape
    d_hid = w1.shape[1]
    d_out = w2.shape[1]

    h_pad = _round_up(d_hid, 128)      # lane-dense hidden width
    d_pad = _round_up(d_out, 128)      # lane-dense output width
    tile_n = min(max_tile_n, _round_up(n, 8))
    n_pad = _round_up(n, tile_n)
    num_tiles = n_pad // tile_n

    f32 = jnp.float32
    xp = x.astype(f32)
    if n_pad != n:
        xp = jnp.pad(xp, ((0, n_pad - n), (0, 0)))
    w1p = jnp.pad(w1.astype(f32), ((0, 0), (0, h_pad - d_hid)))
    b1p = jnp.pad(b1.astype(f32).reshape(1, -1), ((0, 0), (0, h_pad - d_hid)))
    w2p = jnp.pad(w2.astype(f32), ((0, h_pad - d_hid), (0, d_pad - d_out)))
    gp = jnp.pad(gamma.astype(f32).reshape(1, -1), ((0, 0), (0, d_pad - d_out)))
    bp = jnp.pad(beta.astype(f32).reshape(1, -1), ((0, 0), (0, d_pad - d_out)))

    # x/out are tiled over N; small parameters get constant index maps (stay VMEM-resident).
    x_spec = pl.BlockSpec((tile_n, d_in), lambda i: (i, 0))
    w1_spec = pl.BlockSpec((d_in, h_pad), lambda i: (0, 0))
    b1_spec = pl.BlockSpec((1, h_pad), lambda i: (0, 0))
    w2_spec = pl.BlockSpec((h_pad, d_pad), lambda i: (0, 0))
    vec_spec = pl.BlockSpec((1, d_pad), lambda i: (0, 0))

    mlp_flops = 2 * n_pad * (d_in * h_pad + h_pad * d_pad)
    param_bytes = 4 * (d_in * h_pad + h_pad + h_pad * d_pad)
    compiler_params = pltpu.CompilerParams(dimension_semantics=("parallel",))

    # ---- pass 1: per-tile MLP + partial BN moments ------------------------------------
    stats = pl.pallas_call(
        functools.partial(_stats_kernel, n_valid=n, need_mask=(n_pad != n)),
        grid=(num_tiles,),
        in_specs=[x_spec, w1_spec, b1_spec, w2_spec],
        out_specs=pl.BlockSpec((1, 2, d_pad), lambda i: (i, 0, 0)),
        out_shape=jax.ShapeDtypeStruct((num_tiles, 2, d_pad), f32),
        compiler_params=compiler_params,
        cost_estimate=pl.CostEstimate(
            flops=mlp_flops, transcendentals=0,
            bytes_accessed=4 * (n_pad * d_in + num_tiles * 2 * d_pad) + param_bytes),
    )(xp, w1p, b1p, w2p)

    # ---- tiny (Dpad,) reduction + scale/shift folding (plain JAX) ----------------------
    total = jnp.sum(stats[:, 0, :], axis=0)
    total_sq = jnp.sum(stats[:, 1, :], axis=0)
    mean = total / n
    var = jnp.maximum(total_sq / n - mean * mean, 0.0)   # biased variance (PyTorch training BN)
    scale = (gp[0] * jax.lax.rsqrt(var + _BN_EPS)).reshape(1, d_pad)
    shift = (bp[0] - mean * scale[0]).reshape(1, d_pad)

    # ---- pass 2: recompute MLP + fused BN affine + ReLU --------------------------------
    out_p = pl.pallas_call(
        _apply_kernel,
        grid=(num_tiles,),
        in_specs=[x_spec, w1_spec, b1_spec, w2_spec, vec_spec, vec_spec],
        out_specs=pl.BlockSpec((tile_n, d_pad), lambda i: (i, 0)),
        out_shape=jax.ShapeDtypeStruct((n_pad, d_pad), x.dtype),
        compiler_params=compiler_params,
        cost_estimate=pl.CostEstimate(
            flops=mlp_flops + 2 * n_pad * d_pad, transcendentals=0,
            bytes_accessed=4 * (n_pad * d_in + n_pad * d_pad) + param_bytes),
    )(xp, w1p, b1p, w2p, scale, shift)

    return out_p[:n, :d_out]


def node_transform_ref(x, w1, b1, w2, b2, gamma, beta):
    """Pure-JAX reference (mirrors PyTorch MLP -> BatchNorm1d(training) -> ReLU)."""
    h = jnp.maximum(x @ w1 + b1, 0.0)
    h = h @ w2 + b2
    mean = jnp.mean(h, axis=0, keepdims=True)
    var = jnp.mean((h - mean) ** 2, axis=0, keepdims=True)
    h = (h - mean) / jnp.sqrt(var + _BN_EPS) * gamma + beta
    return jnp.maximum(h, 0.0)


if __name__ == "__main__":
    # Small synthetic shapes consistent with a graph-node feature transform.
    N = 128          # number of nodes (batch axis for BatchNorm1d)
    D_IN = 32        # input node-feature dim
    D_HID = 64       # MLP hidden dim
    D_OUT = 32       # mlp.output_dim (BatchNorm size)

    key = jax.random.PRNGKey(0)
    kx, kw1, kb1, kw2, kb2 = jax.random.split(key, 5)

    x = jax.random.normal(kx, (N, D_IN), dtype=jnp.float32)

    # Deterministic parameter init (synthetic — not a checkpoint load).  Weights are stored
    # as (in, out), i.e. the transpose of torch.nn.Linear.weight.
    w1 = jax.random.normal(kw1, (D_IN, D_HID), dtype=jnp.float32) * 0.1
    b1 = jax.random.normal(kb1, (1, D_HID), dtype=jnp.float32) * 0.01
    w2 = jax.random.normal(kw2, (D_HID, D_OUT), dtype=jnp.float32) * 0.1
    b2 = jax.random.normal(kb2, (1, D_OUT), dtype=jnp.float32) * 0.01
    gamma = jnp.ones((1, D_OUT), dtype=jnp.float32)   # BatchNorm weight init (PyTorch default)
    beta = jnp.zeros((1, D_OUT), dtype=jnp.float32)   # BatchNorm bias init (PyTorch default)

    out = node_transform(x, w1, b1, w2, b2, gamma, beta)
    out = jax.block_until_ready(out)

    ref = node_transform_ref(x, w1, b1, w2, b2, gamma, beta)
    assert out.shape == (N, D_OUT)
    assert jnp.max(jnp.abs(out - ref)) < 1e-4, "kernel/reference mismatch"

    print("KERNEL_OK")
</pallas_src>

<mosaic_0001>
module attributes {stable_mosaic.version = 11 : i64} {
  func.func @_stats_kernel(%arg0: i32, %arg1: memref<128x32xf32, #tpu.memory_space<vmem>>, %arg2: memref<32x128xf32, #tpu.memory_space<vmem>>, %arg3: memref<1x128xf32, #tpu.memory_space<vmem>>, %arg4: memref<128x128xf32, #tpu.memory_space<vmem>>, %arg5: memref<1x2x128xf32, #tpu.memory_space<vmem>>) attributes {dimension_semantics = [#tpu.dimension_semantics<parallel>], iteration_bounds = array<i64: 1>, scalar_prefetch = 0 : i64, scratch_operands = 0 : i64, tpu.core_type = #tpu.core_type<tc>, window_params = [{transform_indices = @transform_0, window_bounds = array<i64: 128, 32>}, {pipeline_mode = #tpu.pipeline_mode<synchronous>, transform_indices = @transform_1, window_bounds = array<i64: 32, 128>}, {pipeline_mode = #tpu.pipeline_mode<synchronous>, transform_indices = @transform_2, window_bounds = array<i64: 1, 128>}, {pipeline_mode = #tpu.pipeline_mode<synchronous>, transform_indices = @transform_3, window_bounds = array<i64: 128, 128>}, {transform_indices = @transform_4, window_bounds = array<i64: 1, 2, 128>}]} {
    %c0 = arith.constant 0 : index
    %c0_0 = arith.constant 0 : index
    %0 = vector.load %arg1[%c0, %c0_0] : memref<128x32xf32, #tpu.memory_space<vmem>>, vector<128x32xf32>
    %c0_1 = arith.constant 0 : index
    %c0_2 = arith.constant 0 : index
    %1 = vector.load %arg2[%c0_1, %c0_2] : memref<32x128xf32, #tpu.memory_space<vmem>>, vector<32x128xf32>
    %cst = arith.constant dense<0.000000e+00> : vector<128x128xf32>
    %2 = tpu.matmul %0, %1, %cst {dimension_numbers = #tpu.dot_dimension_numbers<[1], [0], [0], [1], [0, 0, 1, 1], [], []>} : vector<128x32xf32>, vector<32x128xf32>, vector<128x128xf32> -> vector<128x128xf32>
    %c0_3 = arith.constant 0 : index
    %c0_4 = arith.constant 0 : index
    %3 = vector.load %arg3[%c0_3, %c0_4] : memref<1x128xf32, #tpu.memory_space<vmem>>, vector<1x128xf32>
    %4 = vector.broadcast %3 : vector<1x128xf32> to vector<128x128xf32>
    %5 = arith.addf %2, %4 : vector<128x128xf32>
    %cst_5 = arith.constant 0.000000e+00 : f32
    %6 = vector.broadcast %cst_5 : f32 to vector<128x128xf32>
    %7 = arith.maximumf %5, %6 : vector<128x128xf32>
    %c0_6 = arith.constant 0 : index
    %c0_7 = arith.constant 0 : index
    %8 = vector.load %arg4[%c0_6, %c0_7] : memref<128x128xf32, #tpu.memory_space<vmem>>, vector<128x128xf32>
    %cst_8 = arith.constant dense<0.000000e+00> : vector<128x128xf32>
    %9 = tpu.matmul %7, %8, %cst_8 {dimension_numbers = #tpu.dot_dimension_numbers<[1], [0], [0], [1], [0, 0, 1, 1], [], []>} : vector<128x128xf32>, vector<128x128xf32>, vector<128x128xf32> -> vector<128x128xf32>
    %cst_9 = arith.constant dense<0.000000e+00> : vector<128xf32>
    %10 = vector.multi_reduction <add>, %9, %cst_9 [0] : vector<128x128xf32> to vector<128xf32>
    %11 = vector.shape_cast %10 : vector<128xf32> to vector<1x128xf32>
    %12 = arith.mulf %9, %9 : vector<128x128xf32>
    %cst_10 = arith.constant dense<0.000000e+00> : vector<128xf32>
    %13 = vector.multi_reduction <add>, %12, %cst_10 [0] : vector<128x128xf32> to vector<128xf32>
    %14 = vector.shape_cast %13 : vector<128xf32> to vector<1x128xf32>
    %15 = tpu.concatenate %11, %14 in 0 : vector<1x128xf32>, vector<1x128xf32> -> vector<2x128xf32>
    %16 = vector.shape_cast %15 : vector<2x128xf32> to vector<1x2x128xf32>
    %c0_11 = arith.constant 0 : index
    %c0_12 = arith.constant 0 : index
    %c0_13 = arith.constant 0 : index
    %17 = vector.load %arg5[%c0_11, %c0_12, %c0_13] : memref<1x2x128xf32, #tpu.memory_space<vmem>>, vector<1x2x128xf32>
    tpu.vector_store %arg5[%c0_11, %c0_12, %c0_13], %16 {strides = array<i32>} : memref<1x2x128xf32, #tpu.memory_space<vmem>>, vector<1x2x128xf32>,
    return
  }
  func.func @transform_0(%arg0: i32) -> (i32, i32) {
    %c0_i32 = arith.constant 0 : i32
    %c0_i32_0 = arith.constant 0 : i32
    return %arg0, %c0_i32 : i32, i32
  }
  func.func @transform_1(%arg0: i32) -> (i32, i32) {
    %c0_i32 = arith.constant 0 : i32
    %c0_i32_0 = arith.constant 0 : i32
    %c0_i32_1 = arith.constant 0 : i32
    return %c0_i32, %c0_i32_0 : i32, i32
  }
  func.func @transform_2(%arg0: i32) -> (i32, i32) {
    %c0_i32 = arith.constant 0 : i32
    %c0_i32_0 = arith.constant 0 : i32
    %c0_i32_1 = arith.constant 0 : i32
    return %c0_i32, %c0_i32_0 : i32, i32
  }
  func.func @transform_3(%arg0: i32) -> (i32, i32) {
    %c0_i32 = arith.constant 0 : i32
    %c0_i32_0 = arith.constant 0 : i32
    %c0_i32_1 = arith.constant 0 : i32
    return %c0_i32, %c0_i32_0 : i32, i32
  }
  func.func @transform_4(%arg0: i32) -> (i32, i32, i32) {
    %c0_i32 = arith.constant 0 : i32
    %c0_i32_0 = arith.constant 0 : i32
    %c0_i32_1 = arith.constant 0 : i32
    return %arg0, %c0_i32, %c0_i32_0 : i32, i32, i32
  }
}

</mosaic_0001>

<bundles_post_ra>
// kernel: tpu_custom_call.1
= control target key start
LH: loop header
LB: loop body
LE: loop exit
PB: predicated region body
PF: predicated region fallthrough
CT: control target
= control target key end

     0   :  { %vm45_vm0 = vcmask 261120   ;;  %s894_s0 = inlined_call_operand.vmem [shape: f32[128,32], index: 0, kind: input, shape index: {}]   ;;  %s895_s1 = inlined_call_operand.vmem [shape: f32[32,128], index: 1, kind: input, shape index: {}]   ;;  %s896_s2 = inlined_call_operand.vmem [shape: f32[1,128], index: 2, kind: input, shape index: {}]   ;;  %s897_s3 = inlined_call_operand.vmem [shape: f32[128,128], index: 3, kind: input, shape index: {}]   ;;  %s898_s4 = inlined_call_operand.hbm [shape: f32[1,2,128], index: 4, kind: output, shape index: {}]  }
   0x1   :  { %v34_v0 = vld [vmem:[%s895_s1] sm:$0xff]  ;;  %v35_v1 = vld [vmem:[%s895_s1 + $0x8] sm:$0xff]  ;;  %v36_v2 = vld [vmem:[%s895_s1 + $0x10] sm:$0xff] }
   0x2   :  { %v648_v3 = vpack.c.bf16 %v35_v1, %v34_v0  ;;  %v37_v4 = vld [vmem:[%s895_s1 + $0x18] sm:$0xff]  ;;  %v18_v5 = vld [vmem:[%s894_s0] sm:$0xff]  ;;  %v256_v8 = vld [vmem:[%s897_s3 + $0x8] sm:$0xff] }
   0x3   :  { %v652_v6 = vpack.c.bf16 %v37_v4, %v36_v2  ;;  %568 = vmatprep.mubr.msk.f32.mxu0 %vm45_vm0, %v18_v5  ;;  %v255_v7 = vld [vmem:[%s897_s3] sm:$0xff]  ;;  %v257_v9 = vld [vmem:[%s897_s3 + $0x10] sm:$0xff]  ;;  %v258_v10 = vld [vmem:[%s897_s3 + $0x18] sm:$0xff] }
   0x4   :  { %649 = vmatprep.subr.bf16.mxu0 %v648_v3  ;;  %v19_v11 = vld [vmem:[%s894_s0 + $0x8] sm:$0xff]  ;;  %v656_v12 = vpack.c.bf16 %v256_v8, %v255_v7  ;;  %v20_v13 = vld [vmem:[%s894_s0 + $0x10] sm:$0xff]  ;;  %v660_v14 = vpack.c.bf16 %v258_v10, %v257_v9  ;;  %v259_v15 = vld [vmem:[%s897_s3 + $0x20] sm:$0xff] }
   0x5   :  { %651 = vmatpush3.bf16.msra.mxu0 %v648_v3  ;;  %v260_v16 = vld [vmem:[%s897_s3 + $0x28] sm:$0xff] }
   0x6   :  { %653 = vmatprep.subr.bf16.mxu0 %v652_v6  ;;  %688 = vmatprep.subr.bf16.mxu1 %v656_v12 }
   0x7   :  { %696 = vmatpush3.bf16.msra.mxu1 %v656_v12 }
   0x9   :  { %655 = vmatpush3.bf16.msra.mxu0 %v652_v6 }
   0xa   :  { %657 = vmatprep.subr.bf16.mxu0 %v656_v12 }
   0xc   :  { %569 = vmatmul.mubr.msk.f32.vlgmr.msra.gmra.mrb[0].mxu0 %vm45_vm0, %v19_v11 }
   0xd   :  { %9 = vsyncpa [#allocation3], 0  ;;  %571 = vmatprep.mubr.msk.f32.mxu0 %vm45_vm0, %v20_v13  ;;  %v21_v17 = vld [vmem:[%s894_s0 + $0x18] sm:$0xff]  ;;  %659 = vmatpush3.bf16.msra.mxu0 %v656_v12  ;;  %v22_v18 = vld [vmem:[%s894_s0 + $0x20] sm:$0xff]  ;;  %v664_v19 = vpack.c.bf16 %v260_v16, %v259_v15  ;;  %vm474_vm1 = vcmask 1040384  }
   0xe   :  { %661 = vmatprep.subr.bf16.mxu0 %v660_v14  ;;  %689 = vmatprep.subr.bf16.mxu1 %v660_v14  ;;  %v261_v20 = vld [vmem:[%s897_s3 + $0x30] sm:$0xff]  ;;  %v262_v21 = vld [vmem:[%s897_s3 + $0x38] sm:$0xff]  ;;  %v23_v22 = vld [vmem:[%s894_s0 + $0x28] sm:$0xff] }
   0xf   :  { %697 = vmatpush3.bf16.msra.mxu1 %v660_v14  ;;  %v24_v23 = vld [vmem:[%s894_s0 + $0x30] sm:$0xff]  ;;  %v668_v24 = vpack.c.bf16 %v262_v21, %v261_v20  ;;  %v263_v25 = vld [vmem:[%s897_s3 + $0x40] sm:$0xff]  ;;  %v264_v26 = vld [vmem:[%s897_s3 + $0x48] sm:$0xff] }
  0x10   :  { %572 = vmatmul.mubr.msk.f32.gmra.mrb[2].mxu0 %vm45_vm0, %v21_v17  ;;  %690 = vmatprep.subr.bf16.mxu1 %v664_v19  ;;  %v25_v27 = vld [vmem:[%s894_s0 + $0x38] sm:$0xff]  ;;  %v26_v28 = vld [vmem:[%s894_s0 + $0x40] sm:$0xff]  ;;  %v672_v29 = vpack.c.bf16 %v264_v26, %v263_v25  ;;  %v265_v30 = vld [vmem:[%s897_s3 + $0x50] sm:$0xff] }
  0x11   :  { %574 = vmatprep.mubr.msk.f32.mxu0 %vm45_vm0, %v22_v18  ;;  %663 = vmatpush3.bf16.msra.mxu0 %v660_v14  ;;  %v266_v31 = vld [vmem:[%s897_s3 + $0x58] sm:$0xff]  ;;  %v27_v32 = vld [vmem:[%s894_s0 + $0x48] sm:$0xff]  ;;  %v28_v33 = vld [vmem:[%s894_s0 + $0x50] sm:$0xff] }
  0x12   :  { %665 = vmatprep.subr.bf16.mxu0 %v664_v19  ;;  %v676_v34 = vpack.c.bf16 %v266_v31, %v265_v30  ;;  %v267_v35 = vld [vmem:[%s897_s3 + $0x60] sm:$0xff]  ;;  %v268_v36 = vld [vmem:[%s897_s3 + $0x68] sm:$0xff]  ;;  %v29_v37 = vld [vmem:[%s894_s0 + $0x58] sm:$0xff] }
  0x13   :  { %698 = vmatpush3.bf16.msra.mxu1 %v664_v19  ;;  %v30_v38 = vld [vmem:[%s894_s0 + $0x60] sm:$0xff]  ;;  %v680_v39 = vpack.c.bf16 %v268_v36, %v267_v35  ;;  %v31_v40 = vld [vmem:[%s894_s0 + $0x68] sm:$0xff]  ;;  %v32_v41 = vld [vmem:[%s894_s0 + $0x70] sm:$0xff] }
  0x14   :  { %575 = vmatmul.mubr.msk.f32.gmra.mrb[4].mxu0 %vm45_vm0, %v23_v22  ;;  %691 = vmatprep.subr.bf16.mxu1 %v668_v24  ;;  %v33_v42 = vld [vmem:[%s894_s0 + $0x78] sm:$0xff]  ;;  %v269_v43 = vld [vmem:[%s897_s3 + $0x70] sm:$0xff]  ;;  %v491_v46 = vld [vmem:[%s896_s2] ss:$0 sm:$0xff]  ;;  %s729_s0 = smov [#allocation2]  }
  0x15   :  { %577 = vmatprep.mubr.msk.f32.mxu0 %vm45_vm0, %v24_v23  ;;  %667 = vmatpush3.bf16.msra.mxu0 %v664_v19  ;;  %v270_v44 = vld [vmem:[%s897_s3 + $0x78] sm:$0xff]  ;;  %s483_s2 = sshll.u32 %s729_s0, 4  ;;  %s484_s2 = int_to_ptr.vmem [resolvable:$true] %s483_s2 }
  0x16   :  { %669 = vmatprep.subr.bf16.mxu0 %v668_v24  ;;  %v684_v45 = vpack.c.bf16 %v270_v44, %v269_v43  ;;  %s705_s3 = scalar_lea.vmem %s484_s2, 32  ;;  %p710_p1 = scmp.lt.s32.totalorder %s484_s2, %s484_s2 }
  0x17   :  { %699 = vmatpush3.bf16.msra.mxu1 %v668_v24  ;;  %p706_p0 = scmp.ne.s32.totalorder %s484_s2, %s705_s3  ;;  %p711_p2 = scmp.lt.s32.totalorder %s705_s3, %s705_s3 }
  0x18   :  { %578 = vmatmul.mubr.msk.f32.gmra.mrb[6].mxu0 %vm45_vm0, %v25_v27  ;;  %692 = vmatprep.subr.bf16.mxu1 %v672_v29 }
  0x19   :  { %580 = vmatprep.mubr.msk.f32.mxu0 %vm45_vm0, %v26_v28  ;;  %671 = vmatpush3.bf16.msra.mxu0 %v668_v24  ;;  %p712_p3 = por %p711_p2, %p710_p1 }
  0x1a   :  { %673 = vmatprep.subr.bf16.mxu0 %v672_v29 }
  0x1b   :  { %700 = vmatpush3.bf16.msra.mxu1 %v672_v29  ;;  %p713_p4 = pnand %p712_p3, %p706_p0 }
  0x1c   :  { %581 = vmatmul.mubr.msk.f32.gmra.mrb[8].mxu0 %vm45_vm0, %v27_v32  ;;  %693 = vmatprep.subr.bf16.mxu1 %v676_v34 }
  0x1d   :  { %583 = vmatprep.mubr.msk.f32.mxu0 %vm45_vm0, %v28_v33  ;;  %675 = vmatpush3.bf16.msra.mxu0 %v672_v29 }
  0x1e   :  { %677 = vmatprep.subr.bf16.mxu0 %v676_v34 }
  0x1f   :  { %701 = vmatpush3.bf16.msra.mxu1 %v676_v34 }
  0x20   :  { %584 = vmatmul.mubr.msk.f32.gmra.mrb[10].mxu0 %vm45_vm0, %v29_v37  ;;  %694 = vmatprep.subr.bf16.mxu1 %v680_v39 }
  0x21   :  { %586 = vmatprep.mubr.msk.f32.mxu0 %vm45_vm0, %v30_v38  ;;  %679 = vmatpush3.bf16.msra.mxu0 %v676_v34 }
  0x22   :  { %681 = vmatprep.subr.bf16.mxu0 %v680_v39 }
  0x23   :  { %702 = vmatpush3.bf16.msra.mxu1 %v680_v39 }
  0x24   :  { %587 = vmatmul.mubr.msk.f32.gmra.mrb[12].mxu0 %vm45_vm0, %v31_v40  ;;  %695 = vmatprep.subr.bf16.mxu1 %v684_v45 }
  0x25   :  { %589 = vmatprep.mubr.msk.f32.mxu0 %vm45_vm0, %v32_v41  ;;  %683 = vmatpush3.bf16.msra.mxu0 %v680_v39 }
  0x26   :  { %685 = vmatprep.subr.bf16.mxu0 %v684_v45 }
  0x27   :  { %703 = vmatpush3.bf16.msra.mxu1 %v684_v45 }
  0x28   :  { %590 = vmatmul.mubr.msk.f32.gmra.mrb[14].mxu0 %vm45_vm0, %v33_v42 }
  0x29   :  { %687 = vmatpush3.bf16.msra.mxu0 %v684_v45 }
  0xdf   :  { %v570_v47 = vpop.f32.mrb[0].mxu0 }
  0xe0   :  { %v166_v48 = vadd.f32 %v570_v47, %v491_v46  ;;  %v160_v49 = vpop.f32.mrb[1].mxu0 }
  0xe1   :  { %v161_v50 = vadd.f32 %v491_v46, %v160_v49 }
  0xe2   :  { %v240_v53 = vmax.f32 %v166_v48, 0.0 }
  0xe3   :  { %v239_v51 = vmax.f32 %v161_v50, 0.0  ;;  %v573_v52 = vpop.f32.mrb[2].mxu0 }
  0xe4   :  { %v176_v54 = vadd.f32 %v573_v52, %v491_v46  ;;  %v170_v55 = vpop.f32.mrb[3].mxu0 }
  0xe5   :  { %v171_v56 = vadd.f32 %v491_v46, %v170_v55  ;;  %624 = vmatprep.mubr.f32.mxu0 %v239_v51 }
  0xe6   :  { %625 = vmatmul.mubr.f32.vlgmr.msra.gmra.mrb[16].mxu0 %v240_v53  ;;  %v242_v59 = vmax.f32 %v176_v54, 0.0 }
  0xe7   :  { %v241_v57 = vmax.f32 %v171_v56, 0.0  ;;  %v576_v58 = vpop.f32.mrb[4].mxu0 }
  0xe8   :  { %v186_v60 = vadd.f32 %v576_v58, %v491_v46  ;;  %v180_v61 = vpop.f32.mrb[5].mxu0 }
  0xe9   :  { %v181_v62 = vadd.f32 %v491_v46, %v180_v61  ;;  %627 = vmatprep.mubr.f32.mxu0 %v241_v57 }
  0xea   :  { %628 = vmatmul.mubr.f32.gmra.mrb[18].mxu0 %v242_v59  ;;  %v244_v1 = vmax.f32 %v186_v60, 0.0 }
  0xeb   :  { %v243_v63 = vmax.f32 %v181_v62, 0.0  ;;  %v579_v0 = vpop.f32.mrb[6].mxu0 }
  0xec   :  { %v196_v2 = vadd.f32 %v579_v0, %v491_v46  ;;  %v190_v3 = vpop.f32.mrb[7].mxu0 }
  0xed   :  { %630 = vmatprep.mubr.f32.mxu0 %v243_v63  ;;  %v191_v4 = vadd.f32 %v491_v46, %v190_v3 }
  0xee   :  { %631 = vmatmul.mubr.f32.gmra.mrb[20].mxu0 %v244_v1  ;;  %v246_v7 = vmax.f32 %v196_v2, 0.0 }
  0xef   :  { %v582_v5 = vpop.f32.mrb[8].mxu0  ;;  %v245_v6 = vmax.f32 %v191_v4, 0.0 }
  0xf0   :  { %v206_v8 = vadd.f32 %v582_v5, %v491_v46  ;;  %v200_v9 = vpop.f32.mrb[9].mxu0 }
  0xf1   :  { %v201_v10 = vadd.f32 %v491_v46, %v200_v9  ;;  %633 = vmatprep.mubr.f32.mxu1 %v245_v6 }
  0xf2   :  { %634 = vmatmul.mubr.f32.vlgmr.msra.gmra.mrb[0].mxu1 %v246_v7  ;;  %v248_v13 = vmax.f32 %v206_v8, 0.0 }
  0xf3   :  { %v247_v11 = vmax.f32 %v201_v10, 0.0  ;;  %v585_v12 = vpop.f32.mrb[10].mxu0 }
  0xf4   :  { %v216_v14 = vadd.f32 %v585_v12, %v491_v46  ;;  %v210_v15 = vpop.f32.mrb[11].mxu0 }
  0xf5   :  { %v211_v16 = vadd.f32 %v491_v46, %v210_v15  ;;  %636 = vmatprep.mubr.f32.mxu1 %v247_v11 }
  0xf6   :  { %637 = vmatmul.mubr.f32.gmra.mrb[2].mxu1 %v248_v13  ;;  %v250_v19 = vmax.f32 %v216_v14, 0.0 }
  0xf7   :  { %v249_v17 = vmax.f32 %v211_v16, 0.0  ;;  %v588_v18 = vpop.f32.mrb[12].mxu0 }
  0xf8   :  { %v226_v20 = vadd.f32 %v588_v18, %v491_v46  ;;  %v220_v21 = vpop.f32.mrb[13].mxu0 }
  0xf9   :  { %v221_v22 = vadd.f32 %v491_v46, %v220_v21  ;;  %639 = vmatprep.mubr.f32.mxu1 %v249_v17 }
  0xfa   :  { %640 = vmatmul.mubr.f32.gmra.mrb[4].mxu1 %v250_v19  ;;  %v252_v25 = vmax.f32 %v226_v20, 0.0 }
  0xfb   :  { %v251_v23 = vmax.f32 %v221_v22, 0.0  ;;  %v591_v24 = vpop.f32.mrb[14].mxu0 }
  0xfc   :  { %v236_v26 = vadd.f32 %v591_v24, %v491_v46  ;;  %v230_v27 = vpop.f32.mrb[15].mxu0 }
  0xfd   :  { %v231_v28 = vadd.f32 %v491_v46, %v230_v27  ;;  %642 = vmatprep.mubr.f32.mxu1 %v251_v23 }
  0xfe   :  { %643 = vmatmul.mubr.f32.gmra.mrb[6].mxu1 %v252_v25  ;;  %v254_v30 = vmax.f32 %v236_v26, 0.0 }
  0xff   :  { %v253_v29 = vmax.f32 %v231_v28, 0.0 }
 0x101   :  { %645 = vmatprep.mubr.f32.mxu1 %v253_v29 }
 0x102   :  { %646 = vmatmul.mubr.f32.gmra.mrb[8].mxu1 %v254_v30 }
 0x1b9   :  { %v626_v31 = vpop.f32.mrb[16].mxu0 }
 0x1ba   :  { %v438_v32 = vmul.f32 %v626_v31, %v626_v31  ;;  %v337_v33 = vpop.f32.mrb[17].mxu0 }
 0x1bb   :  { %v416_v34 = vadd.f32 %v626_v31, %v337_v33  ;;  %v437_v35 = vmul.f32 %v337_v33, %v337_v33 }
 0x1bd   :  { %v453_v36 = vadd.f32 %v438_v32, %v437_v35  ;;  %v629_v37 = vpop.f32.mrb[18].mxu0 }
 0x1be   :  { %v347_v38 = vpop.f32.mrb[19].mxu0  ;;  %v440_v41 = vmul.f32 %v629_v37, %v629_v37 }
 0x1bf   :  { %v417_v39 = vadd.f32 %v416_v34, %v347_v38  ;;  %v439_v40 = vmul.f32 %v347_v38, %v347_v38 }
 0x1c1   :  { %v454_v42 = vadd.f32 %v453_v36, %v439_v40  ;;  %v632_v43 = vpop.f32.mrb[20].mxu0  ;;  %v418_v44 = vadd.f32 %v629_v37, %v417_v39 }
 0x1c2   :  { %v357_v45 = vpop.f32.mrb[21].mxu0  ;;  %v442_v49 = vmul.f32 %v632_v43, %v632_v43 }
 0x1c3   :  { %v419_v46 = vadd.f32 %v418_v44, %v357_v45  ;;  %v441_v47 = vmul.f32 %v357_v45, %v357_v45  ;;  %v455_v48 = vadd.f32 %v454_v42, %v440_v41 }
 0x1c5   :  { %v420_v50 = vadd.f32 %v632_v43, %v419_v46  ;;  %v456_v51 = vadd.f32 %v455_v48, %v441_v47  ;;  %v635_v52 = vpop.f32.mrb[0].mxu1 }
 0x1c6   :  { %v367_v53 = vpop.f32.mrb[1].mxu1  ;;  %v444_v57 = vmul.f32 %v635_v52, %v635_v52 }
 0x1c7   :  { %v457_v54 = vadd.f32 %v456_v51, %v442_v49  ;;  %v421_v55 = vadd.f32 %v420_v50, %v367_v53  ;;  %v443_v56 = vmul.f32 %v367_v53, %v367_v53 }
 0x1c9   :  { %v458_v58 = vadd.f32 %v457_v54, %v443_v56  ;;  %v638_v59 = vpop.f32.mrb[2].mxu1  ;;  %v422_v60 = vadd.f32 %v635_v52, %v421_v55 }
 0x1ca   :  { %v377_v61 = vpop.f32.mrb[3].mxu1  ;;  %v446_v1 = vmul.f32 %v638_v59, %v638_v59 }
 0x1cb   :  { %v423_v62 = vadd.f32 %v422_v60, %v377_v61  ;;  %v445_v63 = vmul.f32 %v377_v61, %v377_v61  ;;  %v459_v0 = vadd.f32 %v458_v58, %v444_v57 }
 0x1cd   :  { %v460_v2 = vadd.f32 %v459_v0, %v445_v63  ;;  %v641_v3 = vpop.f32.mrb[4].mxu1  ;;  %v424_v4 = vadd.f32 %v638_v59, %v423_v62 }
 0x1ce   :  { %v387_v5 = vpop.f32.mrb[5].mxu1  ;;  %v448_v9 = vmul.f32 %v641_v3, %v641_v3 }
 0x1cf   :  { %v425_v6 = vadd.f32 %v424_v4, %v387_v5  ;;  %v447_v7 = vmul.f32 %v387_v5, %v387_v5  ;;  %v461_v8 = vadd.f32 %v460_v2, %v446_v1 }
 0x1d1   :  { %v462_v10 = vadd.f32 %v461_v8, %v447_v7  ;;  %v644_v11 = vpop.f32.mrb[6].mxu1  ;;  %v426_v12 = vadd.f32 %v641_v3, %v425_v6 }
 0x1d2   :  { %v397_v13 = vpop.f32.mrb[7].mxu1  ;;  %v450_v17 = vmul.f32 %v644_v11, %v644_v11 }
 0x1d3   :  { %v427_v14 = vadd.f32 %v426_v12, %v397_v13  ;;  %v449_v15 = vmul.f32 %v397_v13, %v397_v13  ;;  %v463_v16 = vadd.f32 %v462_v10, %v448_v9 }
 0x1d5   :  { %v464_v18 = vadd.f32 %v463_v16, %v449_v15  ;;  %v647_v19 = vpop.f32.mrb[8].mxu1  ;;  %v428_v20 = vadd.f32 %v644_v11, %v427_v14 }
 0x1d6   :  { %v407_v21 = vpop.f32.mrb[9].mxu1  ;;  %v452_v25 = vmul.f32 %v647_v19, %v647_v19 }
 0x1d7   :  { %v429_v22 = vadd.f32 %v428_v20, %v407_v21  ;;  %v451_v23 = vmul.f32 %v407_v21, %v407_v21  ;;  %v465_v24 = vadd.f32 %v464_v18, %v450_v17 }
 0x1d9   :  { %v430_v26 = vadd.f32 %v647_v19, %v429_v22  ;;  %v466_v27 = vadd.f32 %v465_v24, %v451_v23 }
 0x1db   :  { %v431_v28 = vrot.slane %v430_v26, 4  ;;  %v467_v29 = vadd.f32 %v466_v27, %v452_v25 }
 0x1dd   :  { %v432_v30 = vadd.f32 %v431_v28, %v430_v26  ;;  %v468_v31 = vrot.slane %v467_v29, 4 }
 0x1df   :  { %v433_v32 = vrot.slane %v432_v30, 2  ;;  %v469_v33 = vadd.f32 %v468_v31, %v467_v29 }
 0x1e1   :  { %v434_v34 = vadd.f32 %v433_v32, %v432_v30  ;;  %v470_v35 = vrot.slane %v469_v33, 2 }
 0x1e3   :  { %v435_v36 = vrot.slane %v434_v34, 1  ;;  %v471_v37 = vadd.f32 %v470_v35, %v469_v33 }
 0x1e5   :  { %v472_v38 = vrot.slane %v471_v37, 1  ;;  %v436_v39 = vadd.f32 %v435_v36, %v434_v34 }
 0x1e7   :  { %v473_v40 = vadd.f32 %v472_v38, %v471_v37 }
 0x1e9   :  { %v475_v41 = vsel %vm474_vm1, %v436_v39, %v473_v40 }
 0x1ea   :  { %476 = vst [vmem:[#allocation2] sm:$0x3] %v475_v41 }
 0x1eb   :  { %716 = shalt.err (!%p713_p4)
}
 0x1ec   :  { %s717_s10 = scalar_lea.hbm %s898_s4, 32 }
 0x1ed   :  { %p718_p5 = scmp.ne.s32.totalorder %s898_s4, %s717_s10  ;;  %p721_p6 = scmp.lt.u32.totalorder %s717_s10, %s898_s4 }
 0x1ef   :  { %p723_p7 = pnand %p721_p6, %p718_p5 }
 0x1f1   :  { %726 = shalt.err (!%p723_p7)
}
 0x1f2   :  { %486 = dma.vmem_to_hbm [thread:$0]  %s484_s2, 32, %s898_s4, [#allocation3]  }
 0x1f3   :  { %727 = dma.done.wait [#allocation3], 32  }
 0x1f4   :  { %728 = vsyncadd [#allocation3], 4294967264 }
 0x1f5   :  { %490 = vsyncpa [#allocation3], 1 }

</bundles_post_ra>
